<compile_context>
chip_gen: v6e
topology: v6e:2x2x1
jax: 0.10.0
libtpu: 0.0.40
codegen_flags: <defaults>
</compile_context>

<pallas_src>
import functools

import jax
import jax.numpy as jnp
from jax.experimental import pallas as pl
from jax.experimental.pallas import tpu as pltpu


LANE = 128      # TPU lane width (last-dim native tile)
TB = 128        # batch tile: fills the MXU M dimension


def qnetwork_kernel(x_ref, w1_ref, b1_ref, w2_ref, b2_ref, w3_ref, b3_ref, o_ref):
    """One (TB, state_size) activation tile through the fused 3-layer MLP."""
    x = x_ref[...]                                            # bf16 (TB, S)

    h1 = jnp.dot(x, w1_ref[...], preferred_element_type=jnp.float32) + b1_ref[...]
    h1 = jnp.maximum(h1, 0.0).astype(jnp.bfloat16)            # (TB, F1)

    h2 = jnp.dot(h1, w2_ref[...], preferred_element_type=jnp.float32) + b2_ref[...]
    h2 = jnp.maximum(h2, 0.0).astype(jnp.bfloat16)            # (TB, F2)

    out = jnp.dot(h2, w3_ref[...], preferred_element_type=jnp.float32) + b3_ref[...]
    o_ref[...] = out.astype(o_ref.dtype)                      # (TB, N_pad) lane-dense


def qnetwork_forward(state, w1, b1, w2, b2, w3, b3, *, tb=TB):
    """Forward pass. state: (B, state_size) f32. Returns (B, action_size) f32."""
    B, state_size = state.shape
    fc1 = w1.shape[1]
    fc2 = w2.shape[1]
    action_size = w3.shape[1]

    # Pad batch to a multiple of the batch tile.
    B_pad = pl.cdiv(B, tb) * tb
    # Pad final output width up to the 128-lane width for unmasked stores.
    N_pad = pl.cdiv(action_size, LANE) * LANE

    x = state.astype(jnp.bfloat16)
    if B_pad != B:
        x = jnp.pad(x, ((0, B_pad - B), (0, 0)))

    w1b = w1.astype(jnp.bfloat16)
    w2b = w2.astype(jnp.bfloat16)
    w3b = jnp.pad(w3, ((0, 0), (0, N_pad - action_size))).astype(jnp.bfloat16)
    b3p = jnp.pad(b3, ((0, 0), (0, N_pad - action_size)))

    # Weights/biases: same block every grid step -> loaded once, VMEM-resident.
    resident = lambda shape: pl.BlockSpec(shape, lambda i: (0, 0))

    out = pl.pallas_call(
        qnetwork_kernel,
        out_shape=jax.ShapeDtypeStruct((B_pad, N_pad), jnp.float32),
        grid_spec=pl.GridSpec(
            grid=(B_pad // tb,),
            in_specs=[
                pl.BlockSpec((tb, state_size), lambda i: (i, 0)),   # activation stream
                resident((state_size, fc1)), resident((1, fc1)),
                resident((fc1, fc2)),        resident((1, fc2)),
                resident((fc2, N_pad)),      resident((1, N_pad)),
            ],
            out_specs=pl.BlockSpec((tb, N_pad), lambda i: (i, 0)),
        ),
        compiler_params=pltpu.CompilerParams(
            dimension_semantics=("parallel",),
        ),
    )(x, w1b, b1, w2b, b2, w3b, b3p)

    return out[:B, :action_size]


def init_linear_params(key, in_features, out_features):
    """Deterministic init mimicking torch.nn.Linear default (U[-1/sqrt(fan_in), +])."""
    kw, kb = jax.random.split(key)
    bound = 1.0 / jnp.sqrt(jnp.float32(in_features))
    # Stored as (in, out) so the kernel computes x @ W.
    w = jax.random.uniform(kw, (in_features, out_features), jnp.float32, -bound, bound)
    b = jax.random.uniform(kb, (1, out_features), jnp.float32, -bound, bound)
    return w, b


if __name__ == "__main__":
    state_size = 32
    action_size = 16
    fc1_unit = 64
    fc2_unit = 64
    batch = 8

    key = jax.random.PRNGKey(0)
    k_state, k1, k2, k3 = jax.random.split(key, 4)

    state = jax.random.normal(k_state, (batch, state_size), jnp.float32)
    w1, b1 = init_linear_params(k1, state_size, fc1_unit)
    w2, b2 = init_linear_params(k2, fc1_unit, fc2_unit)
    w3, b3 = init_linear_params(k3, fc2_unit, action_size)

    out = qnetwork_forward(state, w1, b1, w2, b2, w3, b3)
    jax.block_until_ready(out)
    assert out.shape == (batch, action_size)

    # Reference with the same bf16-matmul / f32-accumulate numerics.
    xb = state.astype(jnp.bfloat16)
    r1 = jnp.maximum(
        jnp.dot(xb, w1.astype(jnp.bfloat16), preferred_element_type=jnp.float32) + b1,
        0.0).astype(jnp.bfloat16)
    r2 = jnp.maximum(
        jnp.dot(r1, w2.astype(jnp.bfloat16), preferred_element_type=jnp.float32) + b2,
        0.0).astype(jnp.bfloat16)
    ref = jnp.dot(r2, w3.astype(jnp.bfloat16), preferred_element_type=jnp.float32) + b3
    assert jnp.allclose(out, ref, atol=2e-3, rtol=2e-3), \
        float(jnp.max(jnp.abs(out - ref)))

    # Loose sanity check against the pure-f32 forward pass (bf16 rounding error).
    f1 = jnp.maximum(state @ w1 + b1, 0.0)
    f2 = jnp.maximum(f1 @ w2 + b2, 0.0)
    ref_f32 = f2 @ w3 + b3
    assert jnp.allclose(out, ref_f32, atol=5e-2, rtol=5e-2)

    print("KERNEL_OK")
</pallas_src>

<mosaic_0001>
module attributes {stable_mosaic.version = 11 : i64} {
  func.func @qnetwork_kernel(%arg0: i32, %arg1: memref<128x32xbf16, #tpu.memory_space<vmem>>, %arg2: memref<32x64xbf16, #tpu.memory_space<vmem>>, %arg3: memref<1x64xf32, #tpu.memory_space<vmem>>, %arg4: memref<64x64xbf16, #tpu.memory_space<vmem>>, %arg5: memref<1x64xf32, #tpu.memory_space<vmem>>, %arg6: memref<64x128xbf16, #tpu.memory_space<vmem>>, %arg7: memref<1x128xf32, #tpu.memory_space<vmem>>, %arg8: memref<128x128xf32, #tpu.memory_space<vmem>>) attributes {dimension_semantics = [#tpu.dimension_semantics<parallel>], iteration_bounds = array<i64: 1>, scalar_prefetch = 0 : i64, scratch_operands = 0 : i64, tpu.core_type = #tpu.core_type<tc>, window_params = [{transform_indices = @transform_0, window_bounds = array<i64: 128, 32>}, {pipeline_mode = #tpu.pipeline_mode<synchronous>, transform_indices = @transform_1, window_bounds = array<i64: 32, 64>}, {pipeline_mode = #tpu.pipeline_mode<synchronous>, transform_indices = @transform_2, window_bounds = array<i64: 1, 64>}, {pipeline_mode = #tpu.pipeline_mode<synchronous>, transform_indices = @transform_3, window_bounds = array<i64: 64, 64>}, {pipeline_mode = #tpu.pipeline_mode<synchronous>, transform_indices = @transform_4, window_bounds = array<i64: 1, 64>}, {pipeline_mode = #tpu.pipeline_mode<synchronous>, transform_indices = @transform_5, window_bounds = array<i64: 64, 128>}, {pipeline_mode = #tpu.pipeline_mode<synchronous>, transform_indices = @transform_6, window_bounds = array<i64: 1, 128>}, {transform_indices = @transform_7, window_bounds = array<i64: 128, 128>}]} {
    %c0 = arith.constant 0 : index
    %c0_0 = arith.constant 0 : index
    %0 = vector.load %arg1[%c0, %c0_0] : memref<128x32xbf16, #tpu.memory_space<vmem>>, vector<128x32xbf16>
    %c0_1 = arith.constant 0 : index
    %c0_2 = arith.constant 0 : index
    %1 = vector.load %arg2[%c0_1, %c0_2] : memref<32x64xbf16, #tpu.memory_space<vmem>>, vector<32x64xbf16>
    %cst = arith.constant dense<0.000000e+00> : vector<128x64xf32>
    %2 = tpu.matmul %0, %1, %cst {dimension_numbers = #tpu.dot_dimension_numbers<[1], [0], [0], [1], [0, 0, 1, 1], [], []>} : vector<128x32xbf16>, vector<32x64xbf16>, vector<128x64xf32> -> vector<128x64xf32>
    %c0_3 = arith.constant 0 : index
    %c0_4 = arith.constant 0 : index
    %3 = vector.load %arg3[%c0_3, %c0_4] : memref<1x64xf32, #tpu.memory_space<vmem>>, vector<1x64xf32>
    %4 = vector.broadcast %3 : vector<1x64xf32> to vector<128x64xf32>
    %5 = arith.addf %2, %4 : vector<128x64xf32>
    %cst_5 = arith.constant 0.000000e+00 : f32
    %6 = vector.broadcast %cst_5 : f32 to vector<128x64xf32>
    %7 = arith.maximumf %5, %6 : vector<128x64xf32>
    %8 = arith.truncf %7 : vector<128x64xf32> to vector<128x64xbf16>
    %c0_6 = arith.constant 0 : index
    %c0_7 = arith.constant 0 : index
    %9 = vector.load %arg4[%c0_6, %c0_7] : memref<64x64xbf16, #tpu.memory_space<vmem>>, vector<64x64xbf16>
    %cst_8 = arith.constant dense<0.000000e+00> : vector<128x64xf32>
    %10 = tpu.matmul %8, %9, %cst_8 {dimension_numbers = #tpu.dot_dimension_numbers<[1], [0], [0], [1], [0, 0, 1, 1], [], []>} : vector<128x64xbf16>, vector<64x64xbf16>, vector<128x64xf32> -> vector<128x64xf32>
    %c0_9 = arith.constant 0 : index
    %c0_10 = arith.constant 0 : index
    %11 = vector.load %arg5[%c0_9, %c0_10] : memref<1x64xf32, #tpu.memory_space<vmem>>, vector<1x64xf32>
    %12 = vector.broadcast %11 : vector<1x64xf32> to vector<128x64xf32>
    %13 = arith.addf %10, %12 : vector<128x64xf32>
    %cst_11 = arith.constant 0.000000e+00 : f32
    %14 = vector.broadcast %cst_11 : f32 to vector<128x64xf32>
    %15 = arith.maximumf %13, %14 : vector<128x64xf32>
    %16 = arith.truncf %15 : vector<128x64xf32> to vector<128x64xbf16>
    %c0_12 = arith.constant 0 : index
    %c0_13 = arith.constant 0 : index
    %17 = vector.load %arg6[%c0_12, %c0_13] : memref<64x128xbf16, #tpu.memory_space<vmem>>, vector<64x128xbf16>
    %cst_14 = arith.constant dense<0.000000e+00> : vector<128x128xf32>
    %18 = tpu.matmul %16, %17, %cst_14 {dimension_numbers = #tpu.dot_dimension_numbers<[1], [0], [0], [1], [0, 0, 1, 1], [], []>} : vector<128x64xbf16>, vector<64x128xbf16>, vector<128x128xf32> -> vector<128x128xf32>
    %c0_15 = arith.constant 0 : index
    %c0_16 = arith.constant 0 : index
    %19 = vector.load %arg7[%c0_15, %c0_16] : memref<1x128xf32, #tpu.memory_space<vmem>>, vector<1x128xf32>
    %20 = vector.broadcast %19 : vector<1x128xf32> to vector<128x128xf32>
    %21 = arith.addf %18, %20 : vector<128x128xf32>
    %c0_17 = arith.constant 0 : index
    %c0_18 = arith.constant 0 : index
    %22 = vector.load %arg8[%c0_17, %c0_18] : memref<128x128xf32, #tpu.memory_space<vmem>>, vector<128x128xf32>
    tpu.vector_store %arg8[%c0_17, %c0_18], %21 {strides = array<i32>} : memref<128x128xf32, #tpu.memory_space<vmem>>, vector<128x128xf32>,
    return
  }
  func.func @transform_0(%arg0: i32) -> (i32, i32) {
    %c0_i32 = arith.constant 0 : i32
    %c0_i32_0 = arith.constant 0 : i32
    return %arg0, %c0_i32 : i32, i32
  }
  func.func @transform_1(%arg0: i32) -> (i32, i32) {
    %c0_i32 = arith.constant 0 : i32
    %c0_i32_0 = arith.constant 0 : i32
    %c0_i32_1 = arith.constant 0 : i32
    return %c0_i32, %c0_i32_0 : i32, i32
  }
  func.func @transform_2(%arg0: i32) -> (i32, i32) {
    %c0_i32 = arith.constant 0 : i32
    %c0_i32_0 = arith.constant 0 : i32
    %c0_i32_1 = arith.constant 0 : i32
    return %c0_i32, %c0_i32_0 : i32, i32
  }
  func.func @transform_3(%arg0: i32) -> (i32, i32) {
    %c0_i32 = arith.constant 0 : i32
    %c0_i32_0 = arith.constant 0 : i32
    %c0_i32_1 = arith.constant 0 : i32
    return %c0_i32, %c0_i32_0 : i32, i32
  }
  func.func @transform_4(%arg0: i32) -> (i32, i32) {
    %c0_i32 = arith.constant 0 : i32
    %c0_i32_0 = arith.constant 0 : i32
    %c0_i32_1 = arith.constant 0 : i32
    return %c0_i32, %c0_i32_0 : i32, i32
  }
  func.func @transform_5(%arg0: i32) -> (i32, i32) {
    %c0_i32 = arith.constant 0 : i32
    %c0_i32_0 = arith.constant 0 : i32
    %c0_i32_1 = arith.constant 0 : i32
    return %c0_i32, %c0_i32_0 : i32, i32
  }
  func.func @transform_6(%arg0: i32) -> (i32, i32) {
    %c0_i32 = arith.constant 0 : i32
    %c0_i32_0 = arith.constant 0 : i32
    %c0_i32_1 = arith.constant 0 : i32
    return %c0_i32, %c0_i32_0 : i32, i32
  }
  func.func @transform_7(%arg0: i32) -> (i32, i32) {
    %c0_i32 = arith.constant 0 : i32
    %c0_i32_0 = arith.constant 0 : i32
    return %arg0, %c0_i32 : i32, i32
  }
}

</mosaic_0001>

<bundles_post_ra>
// kernel: tpu_custom_call.1
= control target key start
LH: loop header
LB: loop body
LE: loop exit
PB: predicated region body
PF: predicated region fallthrough
CT: control target
= control target key end

     0   :  { %vm107_vm0 = vcmask 261120   ;;  %s957_s0 = inlined_call_operand.vmem [shape: bf16[128,32], index: 0, kind: input, shape index: {}]   ;;  %s958_s1 = inlined_call_operand.vmem [shape: bf16[32,64], index: 1, kind: input, shape index: {}]   ;;  %s959_s2 = inlined_call_operand.vmem [shape: f32[1,64], index: 2, kind: input, shape index: {}]   ;;  %s960_s3 = inlined_call_operand.vmem [shape: bf16[64,64], index: 3, kind: input, shape index: {}]   ;;  %s961_s4 = inlined_call_operand.vmem [shape: f32[1,64], index: 4, kind: input, shape index: {}]   ;;  %s962_s5 = inlined_call_operand.vmem [shape: bf16[64,128], index: 5, kind: input, shape index: {}]   ;;  %s963_s6 = inlined_call_operand.vmem [shape: f32[1,128], index: 6, kind: input, shape index: {}]   ;;  %s964_s7 = inlined_call_operand.hbm [shape: f32[128,128], index: 7, kind: output, shape index: {}]  }
   0x1   :  { %v784_v0 = vld [vmem:[%s958_s1 + $0x8] sm:$0xff]   ;;  %v785_v1 = vld [vmem:[%s958_s1] sm:$0xff]   ;;  %v788_v4 = vld [vmem:[%s957_s0 + $0x10] sm:$0xff]  }
   0x2   :  { %709 = vmatprep.subr.bf16.mxu0 %v784_v0  ;;  %v786_v2 = vld [vmem:[%s957_s0] sm:$0xff]   ;;  %777 = vmatprep.subr.bf16.mxu1 %v784_v0  ;;  %v787_v3 = vld [vmem:[%s957_s0 + $0x8] sm:$0xff]   ;;  %v792_v7 = vld [vmem:[%s957_s0 + $0x30] sm:$0xff]  }
   0x3   :  { %710 = vmatpush3.bf16.msra.mxu0 %v784_v0  ;;  %779 = vmatpush3.bf16.msra.mxu1 %v784_v0  ;;  %v790_v5 = vld [vmem:[%s957_s0 + $0x20] sm:$0xff]   ;;  %v791_v6 = vld [vmem:[%s957_s0 + $0x28] sm:$0xff]   ;;  %v794_v8 = vld [vmem:[%s960_s3 + $0x18] sm:$0xff]  }
   0x4   :  { %711 = vmatprep.subr.bf16.mxu0 %v785_v1  ;;  %713 = vmatprep.mubr.msk.bf16.mxu0 %vm107_vm0, %v786_v2  ;;  %v789_v9 = vld [vmem:[%s957_s0 + $0x18] sm:$0xff]  }
   0x5   :  { %778 = vmatprep.subr.bf16.mxu1 %v785_v1  ;;  %721 = vmatprep.mubr.msk.bf16.mxu1 %vm107_vm0, %v790_v5  ;;  %v793_v10 = vld [vmem:[%s957_s0 + $0x38] sm:$0xff]  }
   0x7   :  { %712 = vmatpush3.bf16.msra.mxu0 %v785_v1  ;;  %780 = vmatpush3.bf16.msra.mxu1 %v785_v1 }
   0x8   :  { %729 = vmatprep.subr.bf16.mxu1 %v794_v8 }
   0xa   :  { %714 = vmatmul.mubr.msk.bf16.vlgmr.msra.gmra.mxu0 %vm107_vm0, %v787_v3  ;;  %722 = vmatmul.mubr.msk.bf16.vlgmr.msra.gmra.mxu1 %vm107_vm0, %v791_v6 }
   0xb   :  { %717 = vmatprep.mubr.msk.bf16.mxu0 %vm107_vm0, %v788_v4  ;;  %725 = vmatprep.mubr.msk.bf16.mxu1 %vm107_vm0, %v792_v7 }
   0xc   :  { %730 = vmatpush3.bf16.msra.mxu1 %v794_v8 }
   0xd   :  { %12 = vsyncpa [#allocation3], 0  ;;  %v795_v11 = vld [vmem:[%s960_s3 + $0x10] sm:$0xff]   ;;  %v796_v12 = vld [vmem:[%s960_s3 + $0x8] sm:$0xff]   ;;  %vm292_vm1 = vcmask 523264  }
   0xe   :  { %731 = vmatprep.subr.bf16.mxu1 %v795_v11  ;;  %v797_v13 = vld [vmem:[%s960_s3] sm:$0xff]   ;;  %v798_v14 = vld [vmem:[%s962_s5 + $0x18] sm:$0xff]   ;;  %v799_v8 = vld [vmem:[%s962_s5 + $0x10] sm:$0xff]  }
   0xf   :  { %753 = vmatprep.subr.bf16.mxu0 %v798_v14  ;;  %v630_v19 = vld [vmem:[%s959_s2] ss:$0 sm:$0xff] }
  0x10   :  { %732 = vmatpush3.bf16.msra.mxu1 %v795_v11  ;;  %754 = vmatpush3.bf16.msra.mxu0 %v798_v14 }
  0x11   :  { %733 = vmatprep.subr.bf16.mxu1 %v796_v12  ;;  %755 = vmatprep.subr.bf16.mxu0 %v799_v8 }
  0x12   :  { %718 = vmatmul.mubr.msk.bf16.gmra.mxu0 %vm107_vm0, %v789_v9  ;;  %726 = vmatmul.mubr.msk.bf16.gmra.mxu1 %vm107_vm0, %v793_v10  ;;  %v800_v9 = vld [vmem:[%s962_s5 + $0x8] sm:$0xff]   ;;  %v801_v10 = vld [vmem:[%s962_s5] sm:$0xff]  }
  0x14   :  { %734 = vmatpush3.bf16.msra.mxu1 %v796_v12  ;;  %756 = vmatpush3.bf16.msra.mxu0 %v799_v8 }
  0x15   :  { %735 = vmatprep.subr.bf16.mxu1 %v797_v13  ;;  %757 = vmatprep.subr.bf16.mxu0 %v800_v9 }
  0x18   :  { %736 = vmatpush3.bf16.msra.mxu1 %v797_v13  ;;  %758 = vmatpush3.bf16.msra.mxu0 %v800_v9  ;;  %v649_v13 = vld [vmem:[%s961_s4] ss:$0 sm:$0xff] }
  0x19   :  { %759 = vmatprep.subr.bf16.mxu0 %v801_v10 }
  0x1c   :  { %760 = vmatpush3.bf16.msra.mxu0 %v801_v10 }
  0xca   :  { %v715_v15 = vpop.f32.mrf.mxu0  ;;  %v723_v16 = vpop.f32.mrf.mxu1 }
  0xcb   :  { %v175_v24 = vadd.f32 %v715_v15, %v630_v19  ;;  %v207_v58 = vadd.f32 %v723_v16, %v630_v19 }
  0xcc   :  { %v166_v17 = vpop.f32.mrf.mxu0  ;;  %v198_v18 = vpop.f32.mrf.mxu1 }
  0xcd   :  { %v167_v22 = vadd.f32 %v630_v19, %v166_v17  ;;  %v231_v33 = vmax.f32 %v175_v24, 0.0  ;;  %v199_v37 = vadd.f32 %v630_v19, %v198_v18  ;;  %v239_v63 = vmax.f32 %v207_v58, 0.0 }
  0xce   :  { %v716_v20 = vpop.f32.mrf.mxu0  ;;  %v724_v21 = vpop.f32.mrf.mxu1 }
  0xcf   :  { %v178_v23 = vadd.f32 %v716_v20, %v630_v19  ;;  %v229_v31 = vmax.f32 %v167_v22, 0.0  ;;  %v237_v46 = vmax.f32 %v199_v37, 0.0  ;;  %v210_v60 = vadd.f32 %v724_v21, %v630_v19 }
  0xd0   :  { %v169_v25 = vpop.f32.mrf.mxu0  ;;  %v201_v26 = vpop.f32.mrf.mxu1 }
  0xd1   :  { %v170_v27 = vadd.f32 %v630_v19, %v169_v25  ;;  %v232_v28 = vmax.f32 %v178_v23, 0.0  ;;  %v202_v38 = vadd.f32 %v630_v19, %v201_v26  ;;  %v240_v0 = vmax.f32 %v210_v60, 0.0 }
  0xd2   :  { %v719_v29 = vpop.f32.mrf.mxu0  ;;  %v727_v30 = vpop.f32.mrf.mxu1 }
  0xd3   :  { %v230_v32 = vmax.f32 %v170_v27, 0.0  ;;  %v246_v39 = vpack.c.bf16 %v232_v28, %v231_v33  ;;  %v191_v44 = vadd.f32 %v719_v29, %v630_v19  ;;  %v238_v48 = vmax.f32 %v202_v38, 0.0 }
  0xd4   :  { %v182_v34 = vpop.f32.mrf.mxu0  ;;  %v214_v35 = vpop.f32.mrf.mxu1  ;;  %v250_v2 = vpack.c.bf16 %v240_v0, %v239_v63  ;;  %v223_v3 = vadd.f32 %v727_v30, %v630_v19 }
  0xd5   :  { %v245_v36 = vpack.c.bf16 %v230_v32, %v229_v31  ;;  %v183_v42 = vadd.f32 %v630_v19, %v182_v34  ;;  %v235_v53 = vmax.f32 %v191_v44, 0.0  ;;  %v249_v55 = vpack.c.bf16 %v238_v48, %v237_v46 }
  0xd6   :  { %v720_v40 = vpop.f32.mrf.mxu0  ;;  %v728_v41 = vpop.f32.mrf.mxu1  ;;  %v215_v56 = vadd.f32 %v630_v19, %v214_v35  ;;  %v243_v5 = vmax.f32 %v223_v3, 0.0 }
  0xd7   :  { %v194_v43 = vadd.f32 %v720_v40, %v630_v19  ;;  %737 = vmatprep.mubr.msk.bf16.mxu1 %vm292_vm1, %v245_v36  ;;  %v233_v51 = vmax.f32 %v183_v42, 0.0  ;;  %v226_v4 = vadd.f32 %v728_v41, %v630_v19 }
  0xd8   :  { %v185_v45 = vpop.f32.mrf.mxu0  ;;  %738 = vmatmul.mubr.msk.bf16.vlgmr.msra.gmra.mxu1 %vm292_vm1, %v246_v39  ;;  %v217_v50 = vpop.f32.mrf.mxu1  ;;  %v241_v61 = vmax.f32 %v215_v56, 0.0 }
  0xd9   :  { %v186_v47 = vadd.f32 %v630_v19, %v185_v45  ;;  %v236_v49 = vmax.f32 %v194_v43, 0.0  ;;  %v218_v57 = vadd.f32 %v630_v19, %v217_v50  ;;  %v244_v6 = vmax.f32 %v226_v4, 0.0  ;;  %v662_v4 = vld [vmem:[%s963_s6] ss:$0 sm:$0xff]  ;;  %s824_s6 = smov [#allocation2]  }
  0xda   :  { %s619_s13 = sshll.u32 %s824_s6, 4  ;;  %s620_s13 = int_to_ptr.vmem [resolvable:$true] %s619_s13 }
  0xdb   :  { %v234_v52 = vmax.f32 %v186_v47, 0.0  ;;  %v248_v59 = vpack.c.bf16 %v236_v49, %v235_v53  ;;  %v242_v62 = vmax.f32 %v218_v57, 0.0  ;;  %v252_v7 = vpack.c.bf16 %v244_v6, %v243_v5  ;;  %s802_s14 = scalar_lea.vmem %s620_s13, 2048  ;;  %p807_p1 = scmp.lt.s32.totalorder %s620_s13, %s620_s13 }
  0xdc   :  { %p803_p0 = scmp.ne.s32.totalorder %s620_s13, %s802_s14  ;;  %p808_p2 = scmp.lt.s32.totalorder %s802_s14, %s802_s14 }
  0xdd   :  { %v247_v54 = vpack.c.bf16 %v234_v52, %v233_v51  ;;  %v251_v1 = vpack.c.bf16 %v242_v62, %v241_v61 }
  0xde   :  { %p809_p3 = por %p808_p2, %p807_p1 }
  0xdf   :  { %741 = vmatprep.mubr.msk.bf16.mxu1 %vm292_vm1, %v247_v54 }
  0xe0   :  { %742 = vmatmul.mubr.msk.bf16.gmra.mxu1 %vm292_vm1, %v248_v59  ;;  %p810_p4 = pnand %p809_p3, %p803_p0 }
  0xe1   :  { %745 = vmatprep.mubr.msk.bf16.mxu1 %vm292_vm1, %v249_v55 }
  0xe8   :  { %746 = vmatmul.mubr.msk.bf16.gmra.mxu1 %vm292_vm1, %v250_v2 }
  0xe9   :  { %749 = vmatprep.mubr.msk.bf16.mxu1 %vm292_vm1, %v251_v1 }
  0xf0   :  { %750 = vmatmul.mubr.msk.bf16.gmra.mxu1 %vm292_vm1, %v252_v7 }
 0x198   :  { %v739_v11 = vpop.f32.mrf.mxu1 }
 0x199   :  { %v360_v17 = vadd.f32 %v739_v11, %v649_v13 }
 0x19a   :  { %v351_v12 = vpop.f32.mrf.mxu1 }
 0x19b   :  { %v352_v15 = vadd.f32 %v649_v13, %v351_v12  ;;  %v416_v24 = vmax.f32 %v360_v17, 0.0 }
 0x19c   :  { %v740_v14 = vpop.f32.mrf.mxu1 }
 0x19d   :  { %v363_v16 = vadd.f32 %v740_v14, %v649_v13  ;;  %v414_v22 = vmax.f32 %v352_v15, 0.0 }
 0x19e   :  { %v354_v18 = vpop.f32.mrf.mxu1 }
 0x19f   :  { %v355_v19 = vadd.f32 %v649_v13, %v354_v18  ;;  %v417_v20 = vmax.f32 %v363_v16, 0.0 }
 0x1a0   :  { %v743_v21 = vpop.f32.mrf.mxu1 }
 0x1a1   :  { %v415_v23 = vmax.f32 %v355_v19, 0.0  ;;  %v431_v27 = vpack.c.bf16 %v417_v20, %v416_v24  ;;  %v376_v31 = vadd.f32 %v743_v21, %v649_v13 }
 0x1a2   :  { %v367_v25 = vpop.f32.mrf.mxu1 }
 0x1a3   :  { %v430_v26 = vpack.c.bf16 %v415_v23, %v414_v22  ;;  %v368_v29 = vadd.f32 %v649_v13, %v367_v25  ;;  %v420_v38 = vmax.f32 %v376_v31, 0.0 }
 0x1a4   :  { %v744_v28 = vpop.f32.mrf.mxu1 }
 0x1a5   :  { %v379_v30 = vadd.f32 %v744_v28, %v649_v13  ;;  %761 = vmatprep.mubr.msk.bf16.mxu0 %vm292_vm1, %v430_v26  ;;  %v418_v36 = vmax.f32 %v368_v29, 0.0 }
 0x1a6   :  { %v370_v32 = vpop.f32.mrf.mxu1  ;;  %762 = vmatmul.mubr.msk.bf16.vlgmr.msra.gmra.mxu0 %vm292_vm1, %v431_v27 }
 0x1a7   :  { %v371_v33 = vadd.f32 %v649_v13, %v370_v32  ;;  %v421_v34 = vmax.f32 %v379_v30, 0.0 }
 0x1a8   :  { %v747_v35 = vpop.f32.mrf.mxu1 }
 0x1a9   :  { %v419_v37 = vmax.f32 %v371_v33, 0.0  ;;  %v433_v41 = vpack.c.bf16 %v421_v34, %v420_v38  ;;  %v392_v45 = vadd.f32 %v747_v35, %v649_v13 }
 0x1aa   :  { %v383_v39 = vpop.f32.mrf.mxu1 }
 0x1ab   :  { %v432_v40 = vpack.c.bf16 %v419_v37, %v418_v36  ;;  %v384_v43 = vadd.f32 %v649_v13, %v383_v39  ;;  %v424_v52 = vmax.f32 %v392_v45, 0.0 }
 0x1ac   :  { %v748_v42 = vpop.f32.mrf.mxu1 }
 0x1ad   :  { %v395_v44 = vadd.f32 %v748_v42, %v649_v13  ;;  %765 = vmatprep.mubr.msk.bf16.mxu0 %vm292_vm1, %v432_v40  ;;  %v422_v50 = vmax.f32 %v384_v43, 0.0 }
 0x1ae   :  { %v386_v46 = vpop.f32.mrf.mxu1  ;;  %766 = vmatmul.mubr.msk.bf16.gmra.mxu0 %vm292_vm1, %v433_v41 }
 0x1af   :  { %v387_v47 = vadd.f32 %v649_v13, %v386_v46  ;;  %v425_v48 = vmax.f32 %v395_v44, 0.0 }
 0x1b0   :  { %v751_v49 = vpop.f32.mrf.mxu1 }
 0x1b1   :  { %v423_v51 = vmax.f32 %v387_v47, 0.0  ;;  %v435_v55 = vpack.c.bf16 %v425_v48, %v424_v52  ;;  %v408_v59 = vadd.f32 %v751_v49, %v649_v13 }
 0x1b2   :  { %v399_v53 = vpop.f32.mrf.mxu1 }
 0x1b3   :  { %v434_v54 = vpack.c.bf16 %v423_v51, %v422_v50  ;;  %v400_v57 = vadd.f32 %v649_v13, %v399_v53  ;;  %v428_v1 = vmax.f32 %v408_v59, 0.0 }
 0x1b4   :  { %v752_v56 = vpop.f32.mrf.mxu1 }
 0x1b5   :  { %v411_v58 = vadd.f32 %v752_v56, %v649_v13  ;;  %769 = vmatprep.mubr.msk.bf16.mxu0 %vm292_vm1, %v434_v54  ;;  %v426_v63 = vmax.f32 %v400_v57, 0.0 }
 0x1b6   :  { %v402_v60 = vpop.f32.mrf.mxu1  ;;  %770 = vmatmul.mubr.msk.bf16.gmra.mxu0 %vm292_vm1, %v435_v55 }
 0x1b7   :  { %v403_v61 = vadd.f32 %v649_v13, %v402_v60  ;;  %v429_v62 = vmax.f32 %v411_v58, 0.0 }
 0x1b9   :  { %v427_v0 = vmax.f32 %v403_v61, 0.0  ;;  %v437_v3 = vpack.c.bf16 %v429_v62, %v428_v1 }
 0x1bb   :  { %v436_v2 = vpack.c.bf16 %v427_v0, %v426_v63 }
 0x1bd   :  { %773 = vmatprep.mubr.msk.bf16.mxu0 %vm292_vm1, %v436_v2 }
 0x1be   :  { %774 = vmatmul.mubr.msk.bf16.gmra.mxu0 %vm292_vm1, %v437_v3 }
 0x266   :  { %v763_v5 = vpop.f32.mrf.mxu0 }
 0x267   :  { %v544_v6 = vadd.f32 %v763_v5, %v662_v4 }
 0x268   :  { %v535_v7 = vpop.f32.mrf.mxu0 }
 0x269   :  { %600 = vst [vmem:[#allocation2 + $0x10] sm:$0xff] %v544_v6  ;;  %v536_v8 = vadd.f32 %v662_v4, %v535_v7 }
 0x26a   :  { %v764_v9 = vpop.f32.mrf.mxu0 }
 0x26b   :  { %598 = vst [vmem:[#allocation2] sm:$0xff] %v536_v8  ;;  %v547_v10 = vadd.f32 %v764_v9, %v662_v4 }
 0x26c   :  { %v538_v11 = vpop.f32.mrf.mxu0 }
 0x26d   :  { %601 = vst [vmem:[#allocation2 + $0x18] sm:$0xff] %v547_v10  ;;  %v539_v12 = vadd.f32 %v662_v4, %v538_v11 }
 0x26e   :  { %v767_v13 = vpop.f32.mrf.mxu0 }
 0x26f   :  { %599 = vst [vmem:[#allocation2 + $0x8] sm:$0xff] %v539_v12  ;;  %v560_v14 = vadd.f32 %v767_v13, %v662_v4 }
 0x270   :  { %v551_v15 = vpop.f32.mrf.mxu0 }
 0x271   :  { %604 = vst [vmem:[#allocation2 + $0x30] sm:$0xff] %v560_v14  ;;  %v552_v16 = vadd.f32 %v662_v4, %v551_v15 }
 0x272   :  { %v768_v17 = vpop.f32.mrf.mxu0 }
 0x273   :  { %602 = vst [vmem:[#allocation2 + $0x20] sm:$0xff] %v552_v16  ;;  %v563_v18 = vadd.f32 %v768_v17, %v662_v4 }
 0x274   :  { %v554_v19 = vpop.f32.mrf.mxu0 }
 0x275   :  { %605 = vst [vmem:[#allocation2 + $0x38] sm:$0xff] %v563_v18  ;;  %v555_v20 = vadd.f32 %v662_v4, %v554_v19 }
 0x276   :  { %v771_v21 = vpop.f32.mrf.mxu0 }
 0x277   :  { %603 = vst [vmem:[#allocation2 + $0x28] sm:$0xff] %v555_v20  ;;  %v576_v22 = vadd.f32 %v771_v21, %v662_v4 }
 0x278   :  { %v567_v23 = vpop.f32.mrf.mxu0 }
 0x279   :  { %608 = vst [vmem:[#allocation2 + $0x50] sm:$0xff] %v576_v22  ;;  %v568_v24 = vadd.f32 %v662_v4, %v567_v23 }
 0x27a   :  { %v772_v25 = vpop.f32.mrf.mxu0 }
 0x27b   :  { %606 = vst [vmem:[#allocation2 + $0x40] sm:$0xff] %v568_v24  ;;  %v579_v26 = vadd.f32 %v772_v25, %v662_v4 }
 0x27c   :  { %v570_v27 = vpop.f32.mrf.mxu0 }
 0x27d   :  { %609 = vst [vmem:[#allocation2 + $0x58] sm:$0xff] %v579_v26  ;;  %v571_v28 = vadd.f32 %v662_v4, %v570_v27 }
 0x27e   :  { %v775_v29 = vpop.f32.mrf.mxu0 }
 0x27f   :  { %607 = vst [vmem:[#allocation2 + $0x48] sm:$0xff] %v571_v28  ;;  %v592_v30 = vadd.f32 %v775_v29, %v662_v4 }
 0x280   :  { %v583_v31 = vpop.f32.mrf.mxu0 }
 0x281   :  { %612 = vst [vmem:[#allocation2 + $0x70] sm:$0xff] %v592_v30  ;;  %v584_v32 = vadd.f32 %v662_v4, %v583_v31 }
 0x282   :  { %v776_v33 = vpop.f32.mrf.mxu0 }
 0x283   :  { %610 = vst [vmem:[#allocation2 + $0x60] sm:$0xff] %v584_v32  ;;  %v595_v34 = vadd.f32 %v776_v33, %v662_v4 }
 0x284   :  { %v586_v35 = vpop.f32.mrf.mxu0 }
 0x285   :  { %613 = vst [vmem:[#allocation2 + $0x78] sm:$0xff] %v595_v34  ;;  %v587_v36 = vadd.f32 %v662_v4, %v586_v35 }
 0x287   :  { %611 = vst [vmem:[#allocation2 + $0x68] sm:$0xff] %v587_v36 }
 0x288   :  { %813 = shalt.err (!%p810_p4)
}
 0x289   :  { %s825_s15 = smov 128   ;;  %s826_s16 = smov 8  }
 0x28a   :  { %625 = dma.vmem_to_hbm [thread:$0]  %s620_s13, 2048, %s964_s7, [#allocation3], %s825_s15, %s825_s15, %s826_s16  }
 0x28b   :  { %822 = dma.done.wait [#allocation3], 2048  }
 0x28c   :  { %823 = vsyncadd [#allocation3], 4294965248 }
 0x28d   :  { %629 = vsyncpa [#allocation3], 1 }

</bundles_post_ra>
